<compile_context>
chip_gen: v6e
topology: v6e:2x2x1
jax: 0.10.0
libtpu: 0.0.40
codegen_flags: <defaults>
</compile_context>

<pallas_src>
import jax
import jax.numpy as jnp
from jax.experimental import pallas as pl
from jax.experimental.pallas import tpu as pltpu


# ---------------------------------------------------------------------------
# Per-generation tiling parameters
# ---------------------------------------------------------------------------
def _gen_params():
    """(tm_cap, tn_cap, vmem_limit_bytes).

    Defaults are v7x-safe (64 MiB physical VMEM -> <=4 MiB f32 blocks, 32 MiB
    scoped limit).  On v5e/v6e (128 MiB VMEM) use ~8 MiB blocks and a 64 MiB
    limit, pushing the mem-bound elementwise kernels toward ~85% of roofline.
    """
    tm_cap, tn_cap, vmem_limit = 256, 4096, 32 * 1024 * 1024
    try:
        if jax.default_backend() == "tpu":
            info = pltpu.get_tpu_info()
            if getattr(info, "vmem_capacity_bytes", 0) >= 96 * 1024 * 1024:
                tm_cap, tn_cap, vmem_limit = 512, 4096, 64 * 1024 * 1024
    except Exception:
        pass  # interpret mode / unknown chip -> conservative defaults
    return tm_cap, tn_cap, vmem_limit


def _pick_tile(dim, align, max_tile, min_blocks=1):
    """Largest tile <= max_tile that divides `dim`, is a multiple of `align`,
    and (when possible) yields >= min_blocks blocks so a 'parallel' grid axis
    has work for both TensorCores on v7x."""
    if dim % align != 0:
        return dim  # full extent is always legal
    cap = min(max_tile, dim)
    if min_blocks > 1 and dim >= align * min_blocks:
        cap = min(cap, dim // min_blocks)
    cap = max((cap // align) * align, align)
    t = cap
    while dim % t != 0:
        t -= align
    return t


def _lane_dense_layout(n):
    """(rows, cols, pad) with cols % 128 == 0 and rows % 8 == 0 so every vreg
    and every store is dense (no masked vst).  Pads with at most a few KiB
    when n has no exact (8k, 128m) factorization."""
    for cols in (4096, 2048, 1024, 512, 256, 128):
        if n % cols == 0 and (n // cols) % 8 == 0:
            return n // cols, cols, 0
    cols = 512 if n >= 8 * 512 else 128
    rows = -(-n // cols)
    rows = ((rows + 7) // 8) * 8
    return rows, cols, rows * cols - n


def _batch_tile(batch):
    """Split the batch into >=2 blocks when possible (megacore work)."""
    if batch >= 2 and batch % 2 == 0:
        return batch // 2
    return batch


# ---------------------------------------------------------------------------
# Pallas kernels
# ---------------------------------------------------------------------------
def _zero_pruned_kernel(idx_ref, x_alias_ref, o_ref):
    # Write-only: pruned-channel blocks are overwritten with exact +0.0.
    # Channels the grid never visits keep their data because the activation
    # is aliased to the output buffer (input_output_aliases).
    del idx_ref, x_alias_ref
    o_ref[...] = jnp.zeros(o_ref.shape, o_ref.dtype)


def _add_noise_kernel(x_ref, noise_ref, o_ref):
    o_ref[...] = x_ref[...] + noise_ref[...]


# ---------------------------------------------------------------------------
# Wrappers around pallas_call
# ---------------------------------------------------------------------------
def prune_channels_pallas(x, indices):
    """z = x.clone(); z[:, indices] = 0.0 (same channel set for every batch row).

    Write-only formulation: grid = (batch_blocks, num_pruned); the output
    BlockSpec picks the channel via the scalar-prefetched index table and the
    kernel writes a zero block; input_output_aliases preserves non-pruned
    channels, so HBM traffic is ~ratio*|x| writes instead of read+write of |x|.
    """
    B, C, H, W = x.shape
    num_pruned = int(indices.shape[0])
    if num_pruned == 0:
        return x
    indices = indices.astype(jnp.int32)

    _, _, vmem_limit = _gen_params()
    bt = _batch_tile(B)
    grid = (B // bt, num_pruned)

    out = pl.pallas_call(
        _zero_pruned_kernel,
        out_shape=jax.ShapeDtypeStruct((B, C, H, W), x.dtype),
        grid_spec=pltpu.PrefetchScalarGridSpec(
            num_scalar_prefetch=1,
            grid=grid,
            in_specs=[
                # x is an input only so it can be aliased to the output; the
                # constant index_map fetches a single tiny (ignored) block
                # instead of re-reading the pruned channels.
                pl.BlockSpec((bt, 1, H, W), lambda p, j, idx_ref: (0, 0, 0, 0)),
            ],
            out_specs=pl.BlockSpec(
                (bt, 1, H, W), lambda p, j, idx_ref: (p, idx_ref[j], 0, 0)
            ),
        ),
        # arg 0 = indices (scalar prefetch), arg 1 = x  ->  output 0
        input_output_aliases={1: 0},
        compiler_params=pltpu.CompilerParams(
            dimension_semantics=("parallel", "arbitrary"),
            vmem_limit_bytes=vmem_limit,
        ),
    )(indices, x)
    return out


def add_noise_pallas(x, noise):
    """Elementwise x + noise on lane-dense 2-D slabs (unmasked stores)."""
    assert noise.shape == x.shape and noise.dtype == x.dtype
    orig_shape = x.shape
    n = x.size
    rows, cols, pad = _lane_dense_layout(n)

    xf = x.reshape(-1)
    nf = noise.reshape(-1)
    if pad:
        xf = jnp.pad(xf, (0, pad))
        nf = jnp.pad(nf, (0, pad))
    x2 = xf.reshape(rows, cols)
    n2 = nf.reshape(rows, cols)

    tm_cap, tn_cap, vmem_limit = _gen_params()
    tm = _pick_tile(rows, 8, tm_cap, min_blocks=2)
    tn = _pick_tile(cols, 128, tn_cap)
    grid = (rows // tm, cols // tn)

    out = pl.pallas_call(
        _add_noise_kernel,
        out_shape=jax.ShapeDtypeStruct((rows, cols), x.dtype),
        grid=grid,
        in_specs=[
            pl.BlockSpec((tm, tn), lambda i, j: (i, j)),
            pl.BlockSpec((tm, tn), lambda i, j: (i, j)),
        ],
        out_specs=pl.BlockSpec((tm, tn), lambda i, j: (i, j)),
        compiler_params=pltpu.CompilerParams(
            dimension_semantics=("parallel", "parallel"),
            vmem_limit_bytes=vmem_limit,
        ),
    )(x2, n2)

    out = out.reshape(-1)
    if pad:
        out = out[:n]
    return out.reshape(orig_shape)


# ---------------------------------------------------------------------------
# PruningNetwork (JAX/Pallas port)
# ---------------------------------------------------------------------------
class PruningNetwork:
    def __init__(self, config, key):
        self.pruning_ratio = config["pruning_ratio"]
        self.pruning_style = config["pruning_style"]
        self.temp = 1.0 / 30.0
        # decoy_layer = nn.Linear(10, 10): unused by forward(), but initialize
        # its parameters deterministically anyway (uniform(-1/sqrt(10), 1/sqrt(10))).
        k1, k2 = jax.random.split(key)
        lim = 1.0 / jnp.sqrt(10.0)
        self.decoy_w = jax.random.uniform(k1, (10, 10), jnp.float32, -lim, lim)
        self.decoy_b = jax.random.uniform(k2, (10,), jnp.float32, -lim, lim)
        if self.pruning_style == "noise":
            self.mean = -1.0
            self.stddev = 2.0
        # TODO(synk): 'network' style (resnet18 tail + fc + sorted-threshold
        # sigmoid channel selection) is not implemented.

    def get_random_channels(self, x, ratio, key):
        num_channels = x.shape[1]
        num_prunable_channels = int(num_channels * ratio)
        return jax.random.permutation(key, num_channels)[:num_prunable_channels]

    def forward(self, x, key):
        if self.pruning_style == "random":
            indices = self.get_random_channels(x, self.pruning_ratio, key)
            x = prune_channels_pallas(x, indices)
        elif self.pruning_style in ["nopruning", "maxentropy", "adversarial"]:
            indices = jax.random.randint(key, (x.shape[0], 30), 1, 100, dtype=jnp.int32)
        elif self.pruning_style == "noise":
            k_idx, k_noise = jax.random.split(key)
            indices = jax.random.randint(k_idx, (x.shape[0], 30), 1, 100, dtype=jnp.int32)
            # TODO(synk): on a TPU-only target, draw the noise on-chip with
            # pltpu.prng_seed/stateful_normal to remove one |x| HBM read; the
            # host draw keeps the kernel portable (no CPU/interpret lowering
            # exists for the TPU PRNG primitives).
            noise = (
                self.mean
                + self.stddev * jax.random.normal(k_noise, x.shape, jnp.float32)
            ).astype(x.dtype)
            x = add_noise_pallas(x, noise)
        else:
            raise NotImplementedError(f"pruning_style={self.pruning_style!r}")
        return (x, indices)


# ---------------------------------------------------------------------------
# Main
# ---------------------------------------------------------------------------
if __name__ == "__main__":
    key = jax.random.PRNGKey(0)
    k_init, k_x, k_rand, k_pass, k_noise = jax.random.split(key, 5)

    B, C, H, W = 2, 4, 16, 16
    x = jax.random.normal(k_x, (B, C, H, W), jnp.float32)

    # --- 'random' pruning style: write-only zeroing kernel -------------------
    net_rand = PruningNetwork({"pruning_ratio": 0.5, "pruning_style": "random"}, k_init)
    out_rand, idx_rand = net_rand.forward(x, k_rand)
    out_rand = jax.block_until_ready(out_rand)
    idx_rand = jax.block_until_ready(idx_rand)

    ref_rand = x.at[:, idx_rand, :, :].set(0.0)
    assert out_rand.shape == x.shape and out_rand.dtype == x.dtype
    assert jnp.array_equal(out_rand, ref_rand), "random-prune mismatch"
    assert bool(jnp.all(out_rand[:, idx_rand, :, :] == 0.0)), "pruned channels not zero"

    # --- 'nopruning' style: passthrough + random indices ---------------------
    net_pass = PruningNetwork({"pruning_ratio": 0.5, "pruning_style": "nopruning"}, k_init)
    out_pass, idx_pass = net_pass.forward(x, k_pass)
    out_pass = jax.block_until_ready(out_pass)
    assert jnp.array_equal(out_pass, x) and idx_pass.shape == (B, 30)

    # --- 'noise' pruning style: fused x + N(mean, std) add kernel ------------
    net_noise = PruningNetwork({"pruning_ratio": 0.5, "pruning_style": "noise"}, k_init)
    out_noise, idx_noise = net_noise.forward(x, k_noise)
    out_noise = jax.block_until_ready(out_noise)
    idx_noise = jax.block_until_ready(idx_noise)

    assert out_noise.shape == x.shape and out_noise.dtype == x.dtype
    assert idx_noise.shape == (B, 30)
    # Reconstruct the exact noise drawn inside forward() and compare bit-exactly.
    _, k_n_ref = jax.random.split(k_noise)
    noise_ref = (
        net_noise.mean
        + net_noise.stddev * jax.random.normal(k_n_ref, x.shape, jnp.float32)
    ).astype(x.dtype)
    ref_noise = x + noise_ref
    assert jnp.allclose(out_noise, ref_noise, atol=1e-6, rtol=0.0), "noise add mismatch"

    print("KERNEL_OK")
</pallas_src>

<mosaic_0001>
module attributes {stable_mosaic.version = 11 : i64} {
  func.func @_zero_pruned_kernel(%arg0: i32, %arg1: i32, %arg2: memref<2xi32, #tpu.memory_space<smem>>, %arg3: memref<1x1x16x16xf32, #tpu.memory_space<vmem>>, %arg4: memref<1x1x16x16xf32, #tpu.memory_space<vmem>>) attributes {dimension_semantics = [#tpu.dimension_semantics<parallel>, #tpu.dimension_semantics<arbitrary>], iteration_bounds = array<i64: 2, 2>, scalar_prefetch = 1 : i64, scratch_operands = 0 : i64, tpu.core_type = #tpu.core_type<tc>, window_params = [{transform_indices = @transform_0, window_bounds = array<i64: 1, 1, 16, 16>}, {transform_indices = @transform_1, window_bounds = array<i64: 1, 1, 16, 16>}]} {
    %cst = arith.constant 0.000000e+00 : f32
    %0 = vector.broadcast %cst : f32 to vector<1x1x16x16xf32>
    %c0 = arith.constant 0 : index
    %c0_0 = arith.constant 0 : index
    %c0_1 = arith.constant 0 : index
    %c0_2 = arith.constant 0 : index
    %1 = vector.load %arg4[%c0, %c0_0, %c0_1, %c0_2] : memref<1x1x16x16xf32, #tpu.memory_space<vmem>>, vector<1x1x16x16xf32>
    tpu.vector_store %arg4[%c0, %c0_0, %c0_1, %c0_2], %0 {strides = array<i32>} : memref<1x1x16x16xf32, #tpu.memory_space<vmem>>, vector<1x1x16x16xf32>,
    return
  }
  func.func @transform_0(%arg0: i32, %arg1: i32, %arg2: memref<2xi32, #tpu.memory_space<smem>>) -> (i32, i32, i32, i32) {
    %c0_i32 = arith.constant 0 : i32
    %c0_i32_0 = arith.constant 0 : i32
    %c0_i32_1 = arith.constant 0 : i32
    %c0_i32_2 = arith.constant 0 : i32
    %c0_i32_3 = arith.constant 0 : i32
    return %c0_i32, %c0_i32_0, %c0_i32_1, %c0_i32_2 : i32, i32, i32, i32
  }
  func.func @transform_1(%arg0: i32, %arg1: i32, %arg2: memref<2xi32, #tpu.memory_space<smem>>) -> (i32, i32, i32, i32) {
    %0 = arith.index_cast %arg1 : i32 to index
    %1 = memref.load %arg2[%0] : memref<2xi32, #tpu.memory_space<smem>>
    %c0_i32 = arith.constant 0 : i32
    %c0_i32_0 = arith.constant 0 : i32
    %c0_i32_1 = arith.constant 0 : i32
    return %arg0, %1, %c0_i32, %c0_i32_0 : i32, i32, i32, i32
  }
}

</mosaic_0001>

<bundles_post_ra>
// kernel: tpu_custom_call.1
= control target key start
LH: loop header
LB: loop body
LE: loop exit
PB: predicated region body
PF: predicated region fallthrough
CT: control target
= control target key end

     0   :  { %s662_s0 = inlined_call_operand.vmem [shape: s32[2], index: 0, kind: input, shape index: {}]   ;;  %s663_s1 = inlined_call_operand.hbm [shape: f32[2,4,16,16], index: 1, kind: input, shape index: {}, may-alias: {1,2}]   ;;  %s664_s2 = inlined_call_operand.hbm [shape: f32[2,4,16,16], index: 2, kind: output, shape index: {}, may-alias: {1,2}]  }
   0x1   :  { %s7_s11 = sshll.u32 %s662_s0, 4  ;;  %s8_s11 = int_to_ptr.vmem [resolvable:$true] %s7_s11 }
   0x2   :  { %s333_s12 = scalar_lea.vmem %s8_s11, 16  ;;  %p338_p1 = scmp.lt.s32.totalorder %s8_s11, %s8_s11 }
   0x3   :  { %p334_p0 = scmp.ne.s32.totalorder %s8_s11, %s333_s12  ;;  %p339_p2 = scmp.lt.s32.totalorder %s333_s12, %s333_s12 }
   0x5   :  { %p340_p3 = por %p339_p2, %p338_p1 }
   0x7   :  { %p341_p4 = pnand %p340_p3, %p334_p0 }
   0x9   :  { %344 = shalt.err (!%p341_p4)  }
   0xa   :  { %s471_s13 = smov [#allocation3]  }
   0xb   :  { %10 = dma.vmem_to_smem %s8_s11, 16, %s471_s13, [#allocation2] }
   0xc   :  { %429 = dma.done.wait [#allocation2], 16 }
   0xd   :  { %430 = vsyncadd [#allocation2], 4294967280 }
   0xe   :  { %12 = sfence }
   0xf   :  { %13 = vsyncpa [#allocation5], 0 }
  0x10   :  { %14 = vsyncpa [#allocation6], 0 }
  0x11   :  { %16 = vsyncpa [#allocation6 + $0x1], 0  ;;  %s497_s14 = smov 0   ;;  %s499_s15 = smov 0  }
  0x12   :  { %s501_s0 = smov 0   ;;  %s503_s16 = smov 0  }
  0x13   :  { %s505_s17 = smov 0   ;;  %s507_s18 = smov 0  }
  0x14   :  { %s509_s19 = smov 0   ;;  %s511_s20 = smov 0  }
  0x15 LB: > { %s230_s21 = sadd.s32 4294967295, %s469_s20   ;;  %s231_s22 = sadd.s32 4294967294, %s469_s20   ;;  %s469_s20 = sphi %s511_s20, %s22_s20   ;;  %s465_s19 = sphi %s509_s19, %s676_s19   ;;  %s461_s18 = sphi %s507_s18, %s675_s18   ;;  %s457_s17 = sphi %s505_s17, %s674_s17   ;;  %s453_s16 = sphi %s503_s16, %s673_s16   ;;  %s449_s0 = sphi %s501_s0, %s672_s0   ;;  %s445_s15 = sphi %s499_s15, %s671_s15   ;;  %s441_s14 = sphi %s497_s14, %s670_s14  }
  0x16   : > { %s31_s23 = sadd.s32 1, %s461_s18  ;;  %s34_s24 = sadd.s32 1, %s465_s19 }
  0x17   : > { %p32_p5 = scmp.ge.s32.totalorder %s31_s23, 2  ;;  %s59_s25 = sld [smem:[#allocation3 + %s461_s18]] }
  0x18   : > { %s66_s26 = sadd.s32 1, %s449_s0  ;;  %p76_p6 = scmp.ne.s32.totalorder %s449_s0, %s445_s15 }
  0x19   : > { %s678_s23 = smov (%p32_p5, %s31_s23), 0  ;;  %s680_s24 = smov (!%p32_p5, %s34_s24), %s465_s19 }
  0x1a   : > { %s60_s27 = sld [smem:[#allocation3 + %s678_s23]]  ;;  %p77_p7 = scmp.eq.s32.totalorder %s230_s21, 3 }
  0x1b   : > { %p36_p8 = scmp.ge.s32.totalorder %s680_s24, 2  ;;  %p82_p9 = scmp.ne.s32.totalorder %s445_s15, %s441_s14 }
  0x1c   : > { %p551_p10 = por %p77_p7, %p76_p6  ;;  %p83_p11 = scmp.eq.s32.totalorder %s231_s22, 3 }
  0x1d   : > { %s682_s24 = smov (%p36_p8, %s680_s24), 0  ;;  %p232_p13 = scmp.ge.s32.totalorder %s469_s20, 1 }
  0x1e   : > { %p557_p12 = por %p83_p11, %p82_p9  ;;  %s61_s30 = ssub.s32 %s465_s19, %s682_s24 }
  0x1f   : > { %p90_p0 = scmp.lt.s32.totalorder %s469_s20, 5  ;;  %p569_p3 = scmp.eq.s32.totalorder %s230_s21, 0 }
  0x20   : > { %s62_s3 = ssub.s32 %s59_s25, %s60_s27  ;;  %s472_s8 = smov [#allocation4]  }
  0x21   : > { %s63_s4 = sor.u32 %s62_s3, %s61_s30  ;;  %p565_p1 = pnand %p232_p13, %p90_p0 }
  0x22   : > { %p64_p2 = scmp.eq.s32.totalorder %s63_s4, 0  ;;  %s102_s9 = sshll.u32 %s472_s8, 4  ;;  %s103_s9 = int_to_ptr.vmem [resolvable:$true] %s102_s9 }
  0x23   : > { %p251_p4 = pneg %p565_p1  ;;  %s356_s11 = scalar_lea.vmem %s103_s9, 256 }
  0x24   : > { %s576_s7 = scalar_select %p64_p2, %s449_s0, %s66_s26  }
  0x25   : > { %p580_p5 = pnand %p569_p3, %p251_p4  ;;  %p357_p7 = scmp.ne.s32.totalorder %s103_s9, %s356_s11 }
  0x26   : > { %p364_p11 = scmp.lt.s32.totalorder %s103_s9, %s103_s9  ;;  %p365_p13 = scmp.lt.s32.totalorder %s356_s11, %s356_s11 }
  0x27   : > { %p347_p6 = pneg %p580_p5 }
  0x28   : > { %p366_p0 = por %p365_p13, %p364_p11 }
  0x29   : > { %p359_p8 = pnand %p357_p7, %p347_p6 }
  0x2b   : > { %p360_p9 = pneg %p359_p8 }
  0x2d   : > { %p367_p2 = pnand %p366_p0, %p360_p9 }
  0x2f   : > { %370 = shalt.err (!%p367_p2)
}
  0x30   : > { %s473_s12 = smov 128   ;;  %s474_s13 = smov 8  }
  0x31   : > { %254 = dma.hbm_to_vmem [thread:$0]  (!%p580_p5), %s663_s1, 256, %s103_s9, [#allocation5], %s473_s12, %s473_s12, %s474_s13  }
  0x32   : > { %118 = sbr.rel (%p565_p1) target bundleno = 84 (0x54), region = 24 }
  0x37   : > { %432 = dma.done.wait (%p569_p3), [#allocation5], 256  }
  0x38   : > { %434 = vsyncadd (%p569_p3), [#allocation5], 4294967040  ;;  %s247_s25 = scalar_select %p551_p10, [#allocation3], [#allocation8]  ;;  %vm134_vm0 = vcmask 130048   ;;  %v475_v0 = vmov 0.0  }
  0x39   : > { %s684_s16 = smov (!%p551_p10, %s453_s16), 0  ;;  %s130_s26 = sand.u32 1, %s445_s15  }
  0x3a   : > { %s145_s27 = sld [smem:[%s247_s25 + %s684_s16]]  ;;  %s236_s30 = sshll.u32 %s130_s26, 4 }
  0x3b   : > { %s132_s3 = scalar_lea.vmem [#allocation7], %s236_s30  ;;  %s239_s5 = sshll.u32 %s457_s17, 3 }
  0x3c   : > { %135 = vst.msk [vmem:[%s132_s3] sm:$0xff] %vm134_vm0, %v475_v0  ;;  %136 = vst.msk [vmem:[%s132_s3 + $0x8] sm:$0xff] %vm134_vm0, %v475_v0  ;;  %s154_s4 = sshll.u32 %s132_s3, 4  ;;  %s611_s12 = scalar_lea.sflag [#allocation6], %s130_s26  ;;  %s604_s4 = int_to_ptr.vmem [resolvable:$true] %s154_s4 }
  0x3d   : > { %s371_s13 = scalar_lea.vmem %s604_s4, 256  ;;  %s476_s17 = smov [#allocation7]  }
  0x3e   : > { %p372_p1 = scmp.ne.s32.totalorder %s604_s4, %s371_s13  ;;  %s375_s21 = sshll.u32 %s476_s17, 4  ;;  %s376_s21 = int_to_ptr.vmem [resolvable:$false] %s375_s21 }
  0x3f   : > { %s377_s22 = scalar_lea.vmem %s376_s21, 512  ;;  %p378_p5 = scmp.lt.s32.totalorder %s604_s4, %s376_s21 }
  0x40   : > { %s238_s6 = sshll.u32 %s145_s27, 1  ;;  %p373_p3 = pnand %p372_p1, %p551_p10 }
  0x41   : > { %s151_s8 = sadd.s32 %s239_s5, %s238_s6  ;;  %p379_p6 = scmp.lt.s32.totalorder %s377_s22, %s371_s13 }
  0x42   : > { %s240_s9 = sshll.u32 %s151_s8, 7  ;;  %p374_p4 = pneg %p373_p3 }
  0x43   : > { %s609_s16 = scalar_lea.hbm %s664_s2, %s240_s9  ;;  %p380_p7 = por %p379_p6, %p378_p5 }
  0x45   : > { %p381_p8 = pnand %p380_p7, %p374_p4 }
  0x47   : > { %384 = shalt.err (!%p381_p8)
}
  0x48   : > { %s385_s25 = scalar_lea.hbm %s609_s16, 256  ;;  %s389_s30 = scalar_lea.hbm %s664_s2, 2048 }
  0x49   : > { %p386_p9 = scmp.ne.s32.totalorder %s609_s16, %s385_s25  ;;  %p390_p0 = scmp.lt.s32.totalorder %s609_s16, %s664_s2 }
  0x4a   : > { %p391_p2 = scmp.lt.s32.totalorder %s389_s30, %s385_s25 }
  0x4b   : > { %p387_p11 = pnand %p386_p9, %p551_p10 }
  0x4c   : > { %p392_p1 = por %p391_p2, %p390_p0 }
  0x4d   : > { %p388_p13 = pneg %p387_p11 }
  0x4f   : > { %p393_p3 = pnand %p392_p1, %p388_p13 }
  0x51   : > { %396 = shalt.err (!%p393_p3)
}
  0x52   : > { %s477_s6 = smov 128   ;;  %s478_s8 = smov 8  }
  0x53   : > { %249 = dma.vmem_to_hbm [thread:$0]  (%p551_p10), %s604_s4, 256, %s609_s16, %s611_s12, %s477_s6, %s477_s6, %s478_s8  }
  0x54 PF: > { %p261_p4 = scmp.ge.s32.totalorder %s469_s20, 2  ;;  %s169_s9 = sand.u32 1, %s441_s14  }
  0x55   : > { %s170_s10 = scalar_lea.sflag [#allocation6], %s169_s9 }
  0x56   : > { %p256_p5 = pnand %p261_p4, %p557_p12 }
  0x58   : > { %p257_p6 = pneg %p256_p5 }
  0x5a   : > { %436 = dma.done.wait (%p257_p6), %s170_s10, 256  }
  0x5b   : > { %438 = vsyncadd (%p257_p6), %s170_s10, 4294967040  ;;  %s22_s20 = sadd.s32 1, %s469_s20   ;;  %s670_s14 = smov %s445_s15 }
  0x5c   : > { %p19_p7 = scmp.ge.s32.totalorder %s22_s20, 6   ;;  %s671_s15 = smov %s449_s0 }
  0x5d   : > { %s672_s0 = smov %s576_s7  ;;  %s673_s16 = smov %s461_s18 }
  0x5e   : > { %s674_s17 = smov %s465_s19  ;;  %s675_s18 = smov %s678_s23 }
  0x5f   : > { %s676_s19 = smov %s682_s24  ;;  %21 = sbr.rel (!%p19_p7) target bundleno = 21 (0x15), region = 61 }
  0x64   :  { %175 = vsyncpa [#allocation5], 1 }
  0x65   :  { %177 = vsyncpa [#allocation5 + $0x1], 1 }
  0x66   :  { %178 = vsyncpa [#allocation6], 1 }
  0x67   :  { %180 = vsyncpa [#allocation6 + $0x1], 1 }

</bundles_post_ra>
